<compile_context>
chip_gen: v5e
topology: v5e:2x2
jax: 0.10.0
libtpu: 0.0.40
codegen_flags: <defaults>
</compile_context>

<pallas_src>
import functools

import jax
import jax.numpy as jnp
from jax.experimental import pallas as pl
from jax.experimental.pallas import tpu as pltpu

HIDDEN = 20          # network_unit in the PyTorch module
NUM_NETS = 3         # A, T, N
NUM_BLOCKS = 8       # stand-in for the 184 per-subject blocks (synthetic demo)


# ---------------------------------------------------------------------------
# Kernel
# ---------------------------------------------------------------------------
def _make_kernel(chunk_groups):
    """Kernel over one chunk of `chunk_groups` block-diagonal groups."""

    def kernel(x_ref, wbd_ref, vbd_ref, out_ref):
        # x_ref   : (T_N, 1)                       resident time grid
        # wbd_ref : (CG, 3, W_PAD, W_PAD)          block-diag [W2, W3, W4ext]
        # vbd_ref : (CG, 8, W_PAD)                 rows [w1, b1, b2, b3, b4ext, 0,0,0]
        # out_ref : (CG, T_N, W_PAD)               first G*3 lanes hold the outputs
        x = x_ref[...]                                             # (T_N, 1)
        for g in range(chunk_groups):                              # short static unroll
            v = vbd_ref[g]                                         # (8, W_PAD)
            # layer 1: (T_N,1) x (1,W) outer product -> pure VPU broadcast
            h = jnp.tanh(x * v[0:1, :] + v[1:2, :])
            # layers 2/3: lane-dense block-diagonal MXU matmuls
            h = jnp.tanh(jnp.dot(h, wbd_ref[g, 0],
                                 preferred_element_type=jnp.float32) + v[2:3, :])
            h = jnp.tanh(jnp.dot(h, wbd_ref[g, 1],
                                 preferred_element_type=jnp.float32) + v[3:4, :])
            # layer 4: block-diag (W -> G*3) matmul embedded in a square slab,
            # so the store is a full 128-lane unmasked write
            y = jnp.dot(h, wbd_ref[g, 2],
                        preferred_element_type=jnp.float32) + v[4:5, :]
            out_ref[g] = y.astype(out_ref.dtype)

    return kernel


# ---------------------------------------------------------------------------
# Wrapper-side packing (plain XLA; done once per weight set / subject list)
# ---------------------------------------------------------------------------
def _gather_and_pack(params, subs, group_subjects):
    """Gather per-subject params and build block-diagonal, (8,128)-dense slabs."""
    G = group_subjects
    K = G * NUM_NETS                   # diagonal blocks per group
    H = HIDDEN
    W = K * H                          # packed lane width (120 for G=2, 240 for G=4)
    W_PAD = -(-W // 128) * 128         # pad to a lane-tile multiple (>=128)
    B_pad = subs.shape[0]
    NG = B_pad // G                    # number of block-diag groups

    def gather(name):                  # (3, NUM_BLOCKS, r, c) -> (3, B_pad, r, c)
        return jnp.take(params[name], subs, axis=1, mode="clip")

    def to_groups(a):                  # (3, B_pad, r, c) -> (NG, K, r, c); k = s*3 + n
        r, c = a.shape[2], a.shape[3]
        return (a.transpose(1, 0, 2, 3)
                 .reshape(NG, G, NUM_NETS, r, c)
                 .reshape(NG, K, r, c))

    eye_k = jnp.eye(K, dtype=jnp.float32)

    def block_diag_sq(a):              # (NG, K, H, H) -> (NG, W_PAD, W_PAD)
        bd = jnp.einsum('gkij,kl->gkilj', a, eye_k).reshape(NG, W, W)
        return jnp.pad(bd, ((0, 0), (0, W_PAD - W), (0, W_PAD - W)))

    w2 = block_diag_sq(to_groups(gather('w2')))
    w3 = block_diag_sq(to_groups(gather('w3')))

    w4g = to_groups(gather('w4'))[..., 0]                        # (NG, K, H)
    w4e = jnp.einsum('gki,kl->gkil', w4g, eye_k).reshape(NG, W, K)
    w4e = jnp.pad(w4e, ((0, 0), (0, W_PAD - W), (0, W_PAD - K)))

    w_bd = jnp.stack([w2, w3, w4e], axis=1)                      # (NG, 3, W_PAD, W_PAD)

    def row(name):                     # (3, B_pad, 1, H) -> (NG, W_PAD)
        r = to_groups(gather(name))[:, :, 0, :].reshape(NG, W)
        return jnp.pad(r, ((0, 0), (0, W_PAD - W)))

    b4 = to_groups(gather('b4'))[:, :, 0, 0]                     # (NG, K)
    b4row = jnp.pad(b4, ((0, 0), (0, W_PAD - K)))

    zeros = jnp.zeros((NG, W_PAD), jnp.float32)
    v_bd = jnp.stack([row('w1'), row('b1'), row('b2'), row('b3'),
                      b4row, zeros, zeros, zeros], axis=1)       # (NG, 8, W_PAD)
    return w_bd, v_bd, W_PAD, K


# ---------------------------------------------------------------------------
# Public forward
# ---------------------------------------------------------------------------
def forward_blocks(x, params, num_subs, *, group_subjects=2, groups_per_step=4):
    """Forward pass for every subject index in `num_subs`, in ONE pallas_call.

    x:        (T_N, 1) float32 time grid
    params:   dict of raw per-subject weights (see init_params)
    num_subs: (B,) int32 subject/block indices
    returns:  (B, T_N, 3) float32
    group_subjects: subjects packed block-diagonally per matmul (2 everywhere;
                    4 on v6e/v7x for 240/256-lane matmuls).
    groups_per_step: groups processed per grid step (short static unroll).
    """
    T_N = x.shape[0]
    B = num_subs.shape[0]
    G = group_subjects

    ng_needed = -(-B // G)
    chunk_groups = max(1, min(groups_per_step, ng_needed))
    ng_total = -(-ng_needed // chunk_groups) * chunk_groups
    b_pad = ng_total * G

    subs = jnp.pad(jnp.asarray(num_subs, jnp.int32), (0, b_pad - B), mode='edge')
    w_bd, v_bd, w_pad, k = _gather_and_pack(params, subs, G)

    grid_spec = pltpu.PrefetchScalarGridSpec(
        num_scalar_prefetch=0,
        grid=(ng_total // chunk_groups,),
        in_specs=[
            # shared time grid: constant block index -> stays resident
            pl.BlockSpec((T_N, 1), lambda i: (0, 0)),
            # contiguous, tile-dense per-chunk weight slabs (pre-gathered)
            pl.BlockSpec((chunk_groups, 3, w_pad, w_pad), lambda i: (i, 0, 0, 0)),
            pl.BlockSpec((chunk_groups, 8, w_pad), lambda i: (i, 0, 0)),
        ],
        out_specs=pl.BlockSpec((chunk_groups, T_N, w_pad), lambda i: (i, 0, 0)),
    )
    out = pl.pallas_call(
        _make_kernel(chunk_groups),
        out_shape=jax.ShapeDtypeStruct((ng_total, T_N, w_pad), jnp.float32),
        grid_spec=grid_spec,
        compiler_params=pltpu.CompilerParams(
            dimension_semantics=("parallel",)),   # independent chunks (2 TCs on v7x)
    )(x, w_bd, v_bd)

    # unpack the lane-dense slab: columns are ordered (subject-in-group, net)
    y = out[:, :, :k]                                            # (NG, T_N, G*3)
    y = (y.reshape(ng_total, T_N, G, NUM_NETS)
          .transpose(0, 2, 1, 3)
          .reshape(b_pad, T_N, NUM_NETS))
    return y[:B]


forward_blocks_jit = jax.jit(
    forward_blocks, static_argnames=("group_subjects", "groups_per_step"))


def simple_network_ad_forward(x, params, num_sub, **kw):
    """Matches SimpleNetworkAD.forward(inputs, num_sub): returns (T_N, 3)."""
    subs = jnp.asarray(num_sub, dtype=jnp.int32).reshape((1,))
    return forward_blocks_jit(x, params, subs, **kw)[0]


# ---------------------------------------------------------------------------
# Params, reference, demo
# ---------------------------------------------------------------------------
def init_params(key):
    """Deterministic init mimicking nn.Linear (U(-1/sqrt(fan_in), +1/sqrt(fan_in))).

    Weights are stored (in, out), i.e. already transposed vs torch's (out, in).
    """
    H = HIDDEN
    shapes = {
        "w1": (NUM_NETS, NUM_BLOCKS, 1, H), "b1": (NUM_NETS, NUM_BLOCKS, 1, H),
        "w2": (NUM_NETS, NUM_BLOCKS, H, H), "b2": (NUM_NETS, NUM_BLOCKS, 1, H),
        "w3": (NUM_NETS, NUM_BLOCKS, H, H), "b3": (NUM_NETS, NUM_BLOCKS, 1, H),
        "w4": (NUM_NETS, NUM_BLOCKS, H, 1), "b4": (NUM_NETS, NUM_BLOCKS, 1, 1),
    }
    fan_in = {"w1": 1, "b1": 1, "w2": H, "b2": H, "w3": H, "b3": H, "w4": H, "b4": H}
    params = {}
    for name, shape in shapes.items():
        key, sub = jax.random.split(key)
        bound = 1.0 / (fan_in[name] ** 0.5)
        params[name] = jax.random.uniform(sub, shape, jnp.float32, -bound, bound)
    return params


def _reference_forward(x, params, num_sub):
    """Pure-JAX reference for correctness checking."""
    cols = []
    for n in range(NUM_NETS):
        h = jnp.tanh(x @ params["w1"][n, num_sub] + params["b1"][n, num_sub])
        h = jnp.tanh(h @ params["w2"][n, num_sub] + params["b2"][n, num_sub])
        h = jnp.tanh(h @ params["w3"][n, num_sub] + params["b3"][n, num_sub])
        y = h @ params["w4"][n, num_sub] + params["b4"][n, num_sub]
        cols.append(y)
    return jnp.concatenate(cols, axis=1)


if __name__ == "__main__":
    key = jax.random.PRNGKey(0)
    params = init_params(key)

    # Synthetic time grid like generate_x(): x = encode_t(i * T_unit), shape (T_N, 1)
    T_N = 8
    T_unit, T_all = 0.1, 10.0
    t = jnp.arange(T_N, dtype=jnp.float32).reshape(T_N, 1) * T_unit
    x = t / T_all * 2.0                                  # encode_t

    # single-subject forward: matches SimpleNetworkAD.forward(inputs, num_sub)
    num_sub = 2
    out = jax.block_until_ready(simple_network_ad_forward(x, params, num_sub))
    ref = _reference_forward(x, params, num_sub)
    assert out.shape == (T_N, NUM_NETS), out.shape
    assert jnp.allclose(out, ref, atol=1e-5, rtol=1e-5), "single-subject mismatch"

    # odd batch size (exercises subject-group and chunk padding)
    subs5 = jnp.arange(5, dtype=jnp.int32)
    out5 = jax.block_until_ready(forward_blocks_jit(x, params, subs5))
    assert out5.shape == (5, T_N, NUM_NETS), out5.shape
    for s in range(5):
        assert jnp.allclose(out5[s], _reference_forward(x, params, s),
                            atol=1e-5, rtol=1e-5), f"mismatch at block {s}"

    # all blocks in one launch, multi-step grid (how loss() would drive the kernel)
    subs_all = jnp.arange(NUM_BLOCKS, dtype=jnp.int32)
    out_all = jax.block_until_ready(
        forward_blocks_jit(x, params, subs_all, groups_per_step=2))
    assert out_all.shape == (NUM_BLOCKS, T_N, NUM_NETS), out_all.shape
    for s in range(NUM_BLOCKS):
        assert jnp.allclose(out_all[s], _reference_forward(x, params, s),
                            atol=1e-5, rtol=1e-5), f"mismatch at block {s}"

    print("KERNEL_OK")
</pallas_src>

<mosaic_0001>
module attributes {stable_mosaic.version = 11 : i64} {
  func.func @kernel(%arg0: i32, %arg1: memref<8x1xf32, #tpu.memory_space<vmem>>, %arg2: memref<1x3x128x128xf32, #tpu.memory_space<vmem>>, %arg3: memref<1x8x128xf32, #tpu.memory_space<vmem>>, %arg4: memref<1x8x128xf32, #tpu.memory_space<vmem>>) attributes {dimension_semantics = [#tpu.dimension_semantics<parallel>], iteration_bounds = array<i64: 1>, scalar_prefetch = 0 : i64, scratch_operands = 0 : i64, tpu.core_type = #tpu.core_type<tc>, window_params = [{pipeline_mode = #tpu.pipeline_mode<synchronous>, transform_indices = @transform_0, window_bounds = array<i64: 8, 1>}, {transform_indices = @transform_1, window_bounds = array<i64: 1, 3, 128, 128>}, {transform_indices = @transform_2, window_bounds = array<i64: 1, 8, 128>}, {transform_indices = @transform_3, window_bounds = array<i64: 1, 8, 128>}]} {
    %c0 = arith.constant 0 : index
    %c0_0 = arith.constant 0 : index
    %0 = vector.load %arg1[%c0, %c0_0] : memref<8x1xf32, #tpu.memory_space<vmem>>, vector<8x1xf32>
    %c0_1 = arith.constant 0 : index
    %c0_2 = arith.constant 0 : index
    %c0_3 = arith.constant 0 : index
    %1 = vector.load %arg3[%c0_1, %c0_2, %c0_3] : memref<1x8x128xf32, #tpu.memory_space<vmem>>, vector<1x8x128xf32>
    %2 = vector.shape_cast %1 : vector<1x8x128xf32> to vector<8x128xf32>
    %3 = vector.extract_strided_slice %2 {offsets = [0, 0], sizes = [1, 128], strides = [1, 1]} : vector<8x128xf32> to vector<1x128xf32>
    %4 = vector.broadcast %0 : vector<8x1xf32> to vector<8x128xf32>
    %5 = vector.broadcast %3 : vector<1x128xf32> to vector<8x128xf32>
    %6 = arith.mulf %4, %5 : vector<8x128xf32>
    %7 = vector.extract_strided_slice %2 {offsets = [1, 0], sizes = [1, 128], strides = [1, 1]} : vector<8x128xf32> to vector<1x128xf32>
    %8 = vector.broadcast %7 : vector<1x128xf32> to vector<8x128xf32>
    %9 = arith.addf %6, %8 : vector<8x128xf32>
    %10 = math.tanh %9 : vector<8x128xf32>
    %c0_4 = arith.constant 0 : index
    %c0_5 = arith.constant 0 : index
    %c0_6 = arith.constant 0 : index
    %c0_7 = arith.constant 0 : index
    %11 = vector.load %arg2[%c0_4, %c0_5, %c0_6, %c0_7] : memref<1x3x128x128xf32, #tpu.memory_space<vmem>>, vector<1x1x128x128xf32>
    %12 = vector.shape_cast %11 : vector<1x1x128x128xf32> to vector<128x128xf32>
    %cst = arith.constant dense<0.000000e+00> : vector<8x128xf32>
    %13 = tpu.matmul %10, %12, %cst {dimension_numbers = #tpu.dot_dimension_numbers<[1], [0], [0], [1], [0, 0, 1, 1], [], []>} : vector<8x128xf32>, vector<128x128xf32>, vector<8x128xf32> -> vector<8x128xf32>
    %14 = vector.extract_strided_slice %2 {offsets = [2, 0], sizes = [1, 128], strides = [1, 1]} : vector<8x128xf32> to vector<1x128xf32>
    %15 = vector.broadcast %14 : vector<1x128xf32> to vector<8x128xf32>
    %16 = arith.addf %13, %15 : vector<8x128xf32>
    %17 = math.tanh %16 : vector<8x128xf32>
    %c0_8 = arith.constant 0 : index
    %c1 = arith.constant 1 : index
    %c0_9 = arith.constant 0 : index
    %c0_10 = arith.constant 0 : index
    %18 = vector.load %arg2[%c0_8, %c1, %c0_9, %c0_10] : memref<1x3x128x128xf32, #tpu.memory_space<vmem>>, vector<1x1x128x128xf32>
    %19 = vector.shape_cast %18 : vector<1x1x128x128xf32> to vector<128x128xf32>
    %cst_11 = arith.constant dense<0.000000e+00> : vector<8x128xf32>
    %20 = tpu.matmul %17, %19, %cst_11 {dimension_numbers = #tpu.dot_dimension_numbers<[1], [0], [0], [1], [0, 0, 1, 1], [], []>} : vector<8x128xf32>, vector<128x128xf32>, vector<8x128xf32> -> vector<8x128xf32>
    %21 = vector.extract_strided_slice %2 {offsets = [3, 0], sizes = [1, 128], strides = [1, 1]} : vector<8x128xf32> to vector<1x128xf32>
    %22 = vector.broadcast %21 : vector<1x128xf32> to vector<8x128xf32>
    %23 = arith.addf %20, %22 : vector<8x128xf32>
    %24 = math.tanh %23 : vector<8x128xf32>
    %c0_12 = arith.constant 0 : index
    %c2 = arith.constant 2 : index
    %c0_13 = arith.constant 0 : index
    %c0_14 = arith.constant 0 : index
    %25 = vector.load %arg2[%c0_12, %c2, %c0_13, %c0_14] : memref<1x3x128x128xf32, #tpu.memory_space<vmem>>, vector<1x1x128x128xf32>
    %26 = vector.shape_cast %25 : vector<1x1x128x128xf32> to vector<128x128xf32>
    %cst_15 = arith.constant dense<0.000000e+00> : vector<8x128xf32>
    %27 = tpu.matmul %24, %26, %cst_15 {dimension_numbers = #tpu.dot_dimension_numbers<[1], [0], [0], [1], [0, 0, 1, 1], [], []>} : vector<8x128xf32>, vector<128x128xf32>, vector<8x128xf32> -> vector<8x128xf32>
    %28 = vector.extract_strided_slice %2 {offsets = [4, 0], sizes = [1, 128], strides = [1, 1]} : vector<8x128xf32> to vector<1x128xf32>
    %29 = vector.broadcast %28 : vector<1x128xf32> to vector<8x128xf32>
    %30 = arith.addf %27, %29 : vector<8x128xf32>
    %c0_16 = arith.constant 0 : index
    %c0_17 = arith.constant 0 : index
    %c0_18 = arith.constant 0 : index
    %31 = vector.load %arg4[%c0_16, %c0_17, %c0_18] : memref<1x8x128xf32, #tpu.memory_space<vmem>>, vector<1x8x128xf32>
    %32 = vector.shape_cast %31 : vector<1x8x128xf32> to vector<8x128xf32>
    %33 = vector.shape_cast %30 : vector<8x128xf32> to vector<1x8x128xf32>
    tpu.vector_store %arg4[%c0_16, %c0_17, %c0_18], %33 {strides = array<i32>} : memref<1x8x128xf32, #tpu.memory_space<vmem>>, vector<1x8x128xf32>,
    return
  }
  func.func @transform_0(%arg0: i32) -> (i32, i32) {
    %c0_i32 = arith.constant 0 : i32
    %c0_i32_0 = arith.constant 0 : i32
    %c0_i32_1 = arith.constant 0 : i32
    return %c0_i32, %c0_i32_0 : i32, i32
  }
  func.func @transform_1(%arg0: i32) -> (i32, i32, i32, i32) {
    %c0_i32 = arith.constant 0 : i32
    %c0_i32_0 = arith.constant 0 : i32
    %c0_i32_1 = arith.constant 0 : i32
    %c0_i32_2 = arith.constant 0 : i32
    return %arg0, %c0_i32, %c0_i32_0, %c0_i32_1 : i32, i32, i32, i32
  }
  func.func @transform_2(%arg0: i32) -> (i32, i32, i32) {
    %c0_i32 = arith.constant 0 : i32
    %c0_i32_0 = arith.constant 0 : i32
    %c0_i32_1 = arith.constant 0 : i32
    return %arg0, %c0_i32, %c0_i32_0 : i32, i32, i32
  }
  func.func @transform_3(%arg0: i32) -> (i32, i32, i32) {
    %c0_i32 = arith.constant 0 : i32
    %c0_i32_0 = arith.constant 0 : i32
    %c0_i32_1 = arith.constant 0 : i32
    return %arg0, %c0_i32, %c0_i32_0 : i32, i32, i32
  }
}

</mosaic_0001>

<bundles_post_ra>
// kernel: forward_blocks.1
= control target key start
LH: loop header
LB: loop body
LE: loop exit
PB: predicated region body
PF: predicated region fallthrough
CT: control target
= control target key end

     0   :  { %v186_v0 = vmov 0   ;;  %s367_s0 = inlined_call_operand.vmem [shape: f32[8,1], index: 0, kind: input, shape index: {}]   ;;  %s368_s1 = inlined_call_operand.vmem [shape: f32[1,3,128,128], index: 1, kind: input, shape index: {}]   ;;  %s369_s2 = inlined_call_operand.vmem [shape: f32[1,8,128], index: 2, kind: input, shape index: {}]   ;;  %s370_s3 = inlined_call_operand.vmem [shape: f32[1,8,128], index: 3, kind: output, shape index: {}]  }
   0x1   :  { %179 = vset.pattern.permute.xlu0 %v186_v0  ;;  %v14_v1 = vld [vmem:[%s367_s0] sm:$0xff]  ;;  %v41_v2 = vld [vmem:[%s368_s1 + $0x78] sm:$0xff]  ;;  %v40_v3 = vld [vmem:[%s368_s1 + $0x70] sm:$0xff] }
   0x2   :  { %18 = vperm.xlu0 %179, %v14_v1   ;;  %43 = vmatpush.msra.mxu0 %v41_v2  ;;  %v39_v4 = vld [vmem:[%s368_s1 + $0x68] sm:$0xff]  ;;  %v38_v5 = vld [vmem:[%s368_s1 + $0x60] sm:$0xff]  ;;  %v37_v6 = vld [vmem:[%s368_s1 + $0x58] sm:$0xff] }
   0x3   :  { %v36_v7 = vld [vmem:[%s368_s1 + $0x50] sm:$0xff]  ;;  %v35_v8 = vld [vmem:[%s368_s1 + $0x48] sm:$0xff]  ;;  %v34_v9 = vld [vmem:[%s368_s1 + $0x40] sm:$0xff] }
   0x4   :  { %44 = vmatpush.msra.mxu0 %v40_v3  ;;  %v33_v10 = vld [vmem:[%s368_s1 + $0x38] sm:$0xff]  ;;  %v32_v11 = vld [vmem:[%s368_s1 + $0x30] sm:$0xff]  ;;  %v31_v12 = vld [vmem:[%s368_s1 + $0x28] sm:$0xff] }
   0x5   :  { %v30_v13 = vld [vmem:[%s368_s1 + $0x20] sm:$0xff]  ;;  %v29_v14 = vld [vmem:[%s368_s1 + $0x18] sm:$0xff]  ;;  %v28_v15 = vld [vmem:[%s368_s1 + $0x10] sm:$0xff] }
   0x6   :  { %45 = vmatpush.msra.mxu0 %v39_v4  ;;  %v27_v16 = vld [vmem:[%s368_s1 + $0x8] sm:$0xff]  ;;  %v26_v17 = vld [vmem:[%s368_s1] sm:$0xff]  ;;  %v161_v18 = vld [vmem:[%s368_s1 + $0xf8] sm:$0xff] }
   0x7   :  { %v160_v19 = vld [vmem:[%s368_s1 + $0xf0] sm:$0xff]  ;;  %82 = vmatpush.msra.mxu1 %v161_v18  ;;  %v159_v20 = vld [vmem:[%s368_s1 + $0xe8] sm:$0xff]  ;;  %v158_v21 = vld [vmem:[%s368_s1 + $0xe0] sm:$0xff] }
   0x8   :  { %46 = vmatpush.msra.mxu0 %v38_v5  ;;  %v157_v22 = vld [vmem:[%s368_s1 + $0xd8] sm:$0xff]  ;;  %v156_v23 = vld [vmem:[%s368_s1 + $0xd0] sm:$0xff]  ;;  %v155_v24 = vld [vmem:[%s368_s1 + $0xc8] sm:$0xff] }
   0x9   :  { %83 = vmatpush.msra.mxu1 %v160_v19  ;;  %v154_v25 = vld [vmem:[%s368_s1 + $0xc0] sm:$0xff]  ;;  %v153_v27 = vld [vmem:[%s368_s1 + $0xb8] sm:$0xff]  ;;  %v152_v28 = vld [vmem:[%s368_s1 + $0xb0] sm:$0xff] }
   0xa   :  { %47 = vmatpush.msra.mxu0 %v37_v6  ;;  %v285_v26 = vld [vmem:[%s369_s2] sm:$0xff]  ;;  %v151_v30 = vld [vmem:[%s368_s1 + $0xa8] sm:$0xff]  ;;  %v149_v37 = vld [vmem:[%s368_s1 + $0x98] sm:$0xff] }
   0xb   :  { %84 = vmatpush.msra.mxu1 %v159_v20  ;;  %v21_v29 = vperm.slane %v285_v26, 0  ;;  %v23_v31 = vperm.slane %v285_v26, 1  ;;  %v150_v36 = vld [vmem:[%s368_s1 + $0xa0] sm:$0xff]  ;;  %v148_v38 = vld [vmem:[%s368_s1 + $0x90] sm:$0xff]  ;;  %v147_v39 = vld [vmem:[%s368_s1 + $0x88] sm:$0xff]  ;;  %v42_v52 = vperm.slane %v285_v26, 2 }
   0xc   :  { %48 = vmatpush.msra.mxu0 %v36_v7  ;;  %v146_v40 = vld [vmem:[%s368_s1 + $0x80] sm:$0xff]  ;;  %v177_v41 = vld [vmem:[%s368_s1 + $0x178] sm:$0xff]  ;;  %v176_v42 = vld [vmem:[%s368_s1 + $0x170] sm:$0xff]  ;;  %v81_v61 = vperm.slane %v285_v26, 3  ;;  %v120_v1 = vperm.slane %v285_v26, 4 }
   0xd   :  { %85 = vmatpush.msra.mxu1 %v158_v21  ;;  %121 = vmatpush.msra.mxu2 %v177_v41  ;;  %v175_v43 = vld [vmem:[%s368_s1 + $0x168] sm:$0xff]  ;;  %v174_v44 = vld [vmem:[%s368_s1 + $0x160] sm:$0xff]  ;;  %v173_v45 = vld [vmem:[%s368_s1 + $0x158] sm:$0xff] }
   0xe   :  { %49 = vmatpush.msra.mxu0 %v35_v8  ;;  %v172_v46 = vld [vmem:[%s368_s1 + $0x150] sm:$0xff]  ;;  %v171_v47 = vld [vmem:[%s368_s1 + $0x148] sm:$0xff]  ;;  %v170_v48 = vld [vmem:[%s368_s1 + $0x140] sm:$0xff] }
   0xf   :  { %86 = vmatpush.msra.mxu1 %v157_v22  ;;  %122 = vmatpush.msra.mxu2 %v176_v42  ;;  %v169_v49 = vld [vmem:[%s368_s1 + $0x138] sm:$0xff]  ;;  %v168_v50 = vld [vmem:[%s368_s1 + $0x130] sm:$0xff]  ;;  %v167_v51 = vld [vmem:[%s368_s1 + $0x128] sm:$0xff] }
  0x10   :  { %50 = vmatpush.msra.mxu0 %v34_v9  ;;  %v166_v56 = vld [vmem:[%s368_s1 + $0x120] sm:$0xff]  ;;  %v165_v57 = vld [vmem:[%s368_s1 + $0x118] sm:$0xff]  ;;  %v164_v58 = vld [vmem:[%s368_s1 + $0x110] sm:$0xff] }
  0x11   :  { %87 = vmatpush.msra.mxu1 %v156_v23  ;;  %123 = vmatpush.msra.mxu2 %v175_v43  ;;  %v163_v59 = vld [vmem:[%s368_s1 + $0x108] sm:$0xff]  ;;  %v162_v60 = vld [vmem:[%s368_s1 + $0x100] sm:$0xff] }
  0x12   :  { %51 = vmatpush.msra.mxu0 %v33_v10 }
  0x13   :  { %88 = vmatpush.msra.mxu1 %v155_v24  ;;  %124 = vmatpush.msra.mxu2 %v174_v44 }
  0x14   :  { %52 = vmatpush.msra.mxu0 %v32_v11 }
  0x15   :  { %89 = vmatpush.msra.mxu1 %v154_v25  ;;  %125 = vmatpush.msra.mxu2 %v173_v45 }
  0x16   :  { %53 = vmatpush.msra.mxu0 %v31_v12 }
  0x17   :  { %90 = vmatpush.msra.mxu1 %v153_v27  ;;  %126 = vmatpush.msra.mxu2 %v172_v46 }
  0x18   :  { %54 = vmatpush.msra.mxu0 %v30_v13 }
  0x19   :  { %91 = vmatpush.msra.mxu1 %v152_v28  ;;  %127 = vmatpush.msra.mxu2 %v171_v47 }
  0x1a   :  { %55 = vmatpush.msra.mxu0 %v29_v14 }
  0x1b   :  { %92 = vmatpush.msra.mxu1 %v151_v30  ;;  %128 = vmatpush.msra.mxu2 %v170_v48 }
  0x1c   :  { %56 = vmatpush.msra.mxu0 %v28_v15 }
  0x1d   :  { %93 = vmatpush.msra.mxu1 %v150_v36  ;;  %129 = vmatpush.msra.mxu2 %v169_v49 }
  0x1e   :  { %57 = vmatpush.msra.mxu0 %v27_v16 }
  0x1f   :  { %94 = vmatpush.msra.mxu1 %v149_v37  ;;  %130 = vmatpush.msra.mxu2 %v168_v50 }
  0x20   :  { %58 = vmatpush.msra.mxu0 %v26_v17 }
  0x21   :  { %95 = vmatpush.msra.mxu1 %v148_v38  ;;  %131 = vmatpush.msra.mxu2 %v167_v51 }
  0x23   :  { %96 = vmatpush.msra.mxu1 %v147_v39  ;;  %132 = vmatpush.msra.mxu2 %v166_v56 }
  0x25   :  { %97 = vmatpush.msra.mxu1 %v146_v40  ;;  %133 = vmatpush.msra.mxu2 %v165_v57 }
  0x27   :  { %134 = vmatpush.msra.mxu2 %v164_v58 }
  0x29   :  { %135 = vmatpush.msra.mxu2 %v163_v59 }
  0x2b   :  { %136 = vmatpush.msra.mxu2 %v162_v60 }
  0x74   :  { %v19_v32 = vpop.permute.xlu0 %18 }
  0x75   :  { %v22_v33 = vmul.f32 %v21_v29, %v19_v32 }
  0x77   :  { %v24_v34 = vadd.f32 %v23_v31, %v22_v33 }
  0x79   :  { %180 = vtanh.f32 %v24_v34 }
  0x7f   :  { %v181_v35 = vpop.eup %180 }
  0x80   :  { %59 = vmatmul.f32.vlgmr.msra.gmra.mxu0 %v181_v35 }
  0xfd   :  { %v60_v53 = vpop.f32.mrf.mxu0 }
  0xfe   :  { %v61_v54 = vadd.f32 %v60_v53, %v42_v52 }
 0x100   :  { %182 = vtanh.f32 %v61_v54 }
 0x106   :  { %v183_v55 = vpop.eup %182 }
 0x107   :  { %98 = vmatmul.f32.vlgmr.msra.gmra.mxu1 %v183_v55 }
 0x184   :  { %v99_v62 = vpop.f32.mrf.mxu1 }
 0x185   :  { %v100_v63 = vadd.f32 %v99_v62, %v81_v61 }
 0x187   :  { %184 = vtanh.f32 %v100_v63 }
 0x18d   :  { %v185_v0 = vpop.eup %184 }
 0x18e   :  { %137 = vmatmul.f32.vlgmr.msra.gmra.mxu2 %v185_v0 }
 0x211   :  { %v138_v2 = vpop.f32.mrf.mxu2 }
 0x212   :  { %v139_v3 = vadd.f32 %v138_v2, %v120_v1 }
 0x214   :  { %141 = vst [vmem:[%s370_s3] sm:$0xff] %v139_v3 }

</bundles_post_ra>
